<compile_context>
chip_gen: v7x
topology: tpu7x:2x2x1
jax: 0.10.0
libtpu: 0.0.40
codegen_flags: <defaults>
</compile_context>

<pallas_src>
import jax
import jax.numpy as jnp
from jax.experimental import pallas as pl
from jax.experimental.pallas import tpu as pltpu


def _dropconnect_kernel(scale_ref, x_ref, o_ref):
    # scale_ref: (TB, 1) per-row scale = floor(keep_prob + u) / keep_prob,
    # i.e. 0.0 for dropped rows and 1/keep_prob for kept rows.  It broadcasts
    # across the lane (feature) axis -> a single VPU multiply per element.
    o_ref[...] = (x_ref[...] * scale_ref[...]).astype(o_ref.dtype)


def _round_up(n, m):
    return ((n + m - 1) // m) * m


def drop_connect(x, *, ratio, key, training=True):
    """JAX/Pallas equivalent of DropConnect(ratio).forward(x)."""
    if not training:
        return x

    keep_prob = 1.0 - ratio
    B, F = x.shape

    # Per-sample uniform -> keep/drop mask, fused with the 1/keep_prob scale.
    # (Same math as PyTorch: x / keep_prob * floor(keep_prob + rand([B, 1]))).
    u = jax.random.uniform(key, (B, 1), dtype=jnp.float32)
    scale = jnp.floor(keep_prob + u) * (1.0 / keep_prob)            # (B, 1)
    scale = scale.astype(x.dtype)

    # Tile sizes: sublane axis multiple of 8, lane axis multiple of 128.
    tb = min(_round_up(B, 8), 256)
    tf = min(_round_up(F, 128), 512)
    b_pad = _round_up(B, tb)
    f_pad = _round_up(F, tf)

    x_p, scale_p = x, scale
    if (b_pad, f_pad) != (B, F):
        x_p = jnp.pad(x, ((0, b_pad - B), (0, f_pad - F)))
        scale_p = jnp.pad(scale, ((0, b_pad - B), (0, 0)))

    out_p = pl.pallas_call(
        _dropconnect_kernel,
        out_shape=jax.ShapeDtypeStruct((b_pad, f_pad), x.dtype),
        grid=(b_pad // tb, f_pad // tf),
        in_specs=[
            pl.BlockSpec((tb, 1), lambda i, j: (i, 0)),     # per-row scale
            pl.BlockSpec((tb, tf), lambda i, j: (i, j)),    # activations
        ],
        out_specs=pl.BlockSpec((tb, tf), lambda i, j: (i, j)),
        compiler_params=pltpu.CompilerParams(
            dimension_semantics=("parallel", "parallel")),
    )(scale_p, x_p)

    if (b_pad, f_pad) != (B, F):
        out_p = out_p[:B, :F]
    return out_p


if __name__ == "__main__":
    key = jax.random.PRNGKey(0)
    kx, kmask = jax.random.split(key)

    # Small, deliberately non-aligned shape: exercises the padding path
    # (B 6 -> 8 sublanes) and a multi-tile feature grid (F 640 -> 1024).
    B, F = 6, 640
    x = jax.random.normal(kx, (B, F), dtype=jnp.float32)

    ratio = 0.3                   # drop ratio -> keep_prob = 0.7
    out = drop_connect(x, ratio=ratio, key=kmask, training=True)
    out = jax.block_until_ready(out)
    assert out.shape == x.shape

    # Sanity: every row is either zeroed (dropped) or exactly x / keep_prob.
    keep_prob = 1.0 - ratio
    scaled = x / keep_prob
    row_is_zero = jnp.all(out == 0.0, axis=1)
    row_is_scaled = jnp.all(jnp.abs(out - scaled) < 1e-5, axis=1)
    assert bool(jnp.all(row_is_zero | row_is_scaled)), "DropConnect semantics violated"

    # Eval mode is the identity.
    out_eval = drop_connect(x, ratio=ratio, key=kmask, training=False)
    assert bool(jnp.all(out_eval == x))

    print("KERNEL_OK")
</pallas_src>

<mosaic_0001>
module attributes {stable_mosaic.version = 11 : i64} {
  func.func @_dropconnect_kernel(%arg0: i32, %arg1: i32, %arg2: memref<8x1xf32, #tpu.memory_space<vmem>>, %arg3: memref<8x512xf32, #tpu.memory_space<vmem>>, %arg4: memref<8x512xf32, #tpu.memory_space<vmem>>) attributes {dimension_semantics = [#tpu.dimension_semantics<parallel>, #tpu.dimension_semantics<parallel>], iteration_bounds = array<i64: 1, 2>, scalar_prefetch = 0 : i64, scratch_operands = 0 : i64, tpu.core_type = #tpu.core_type<tc>, window_params = [{transform_indices = @transform_0, window_bounds = array<i64: 8, 1>}, {transform_indices = @transform_1, window_bounds = array<i64: 8, 512>}, {transform_indices = @transform_2, window_bounds = array<i64: 8, 512>}]} {
    %c0 = arith.constant 0 : index
    %c0_0 = arith.constant 0 : index
    %0 = vector.load %arg3[%c0, %c0_0] : memref<8x512xf32, #tpu.memory_space<vmem>>, vector<8x512xf32>
    %c0_1 = arith.constant 0 : index
    %c0_2 = arith.constant 0 : index
    %1 = vector.load %arg2[%c0_1, %c0_2] : memref<8x1xf32, #tpu.memory_space<vmem>>, vector<8x1xf32>
    %2 = vector.broadcast %1 : vector<8x1xf32> to vector<8x512xf32>
    %3 = arith.mulf %0, %2 : vector<8x512xf32>
    %c0_3 = arith.constant 0 : index
    %c0_4 = arith.constant 0 : index
    %4 = vector.load %arg4[%c0_3, %c0_4] : memref<8x512xf32, #tpu.memory_space<vmem>>, vector<8x512xf32>
    tpu.vector_store %arg4[%c0_3, %c0_4], %3 {strides = array<i32>} : memref<8x512xf32, #tpu.memory_space<vmem>>, vector<8x512xf32>,
    return
  }
  func.func @transform_0(%arg0: i32, %arg1: i32) -> (i32, i32) {
    %c0_i32 = arith.constant 0 : i32
    %c0_i32_0 = arith.constant 0 : i32
    return %arg0, %c0_i32 : i32, i32
  }
  func.func @transform_1(%arg0: i32, %arg1: i32) -> (i32, i32) {
    %c0_i32 = arith.constant 0 : i32
    return %arg0, %arg1 : i32, i32
  }
  func.func @transform_2(%arg0: i32, %arg1: i32) -> (i32, i32) {
    %c0_i32 = arith.constant 0 : i32
    return %arg0, %arg1 : i32, i32
  }
}

</mosaic_0001>

<bundles_post_ra>
// kernel: tpu_custom_call.1
= control target key start
LH: loop header
LB: loop body
LE: loop exit
PB: predicated region body
PF: predicated region fallthrough
CT: control target
= control target key end

     0   :  { %7 = vsyncpa [#allocation3], 0  ;;  %s720_s0 = inlined_call_operand.vmem [shape: f32[8,1], index: 0, kind: input, shape index: {}]   ;;  %s721_s1 = inlined_call_operand.hbm [shape: f32[8,1024], index: 1, kind: input, shape index: {}]   ;;  %s722_s2 = inlined_call_operand.hbm [shape: f32[8,1024], index: 2, kind: output, shape index: {}]  }
   0x1   :  { %9 = vsyncpa [#allocation3 + $0x1], 0 }
   0x2   :  { %10 = vsyncpa [#allocation4], 0 }
   0x3   :  { %12 = vsyncpa [#allocation4 + $0x1], 0  ;;  %s545_s9 = smov 0   ;;  %s547_s10 = smov 0  }
   0x4   :  { %s549_s11 = smov 0   ;;  %s551_s12 = smov 0  }
   0x5   :  { %s553_s13 = smov 0   ;;  %s555_s14 = smov 0  }
   0x6 LB: > { %s331_s15 = sadd.s32 4294967295, %s525_s14   ;;  %s332_s16 = sadd.s32 4294967294, %s525_s14   ;;  %s525_s14 = sphi %s555_s14, %s18_s14   ;;  %s521_s13 = sphi %s553_s13, %s738_s13   ;;  %s517_s12 = sphi %s551_s12, %s737_s12   ;;  %s513_s11 = sphi %s549_s11, %s736_s11   ;;  %s509_s10 = sphi %s547_s10, %s735_s10   ;;  %s505_s9 = sphi %s545_s9, %s734_s9  }
   0x7   : > { %s27_s17 = sadd.s32 1, %s521_s13  ;;  %s65_s18 = sadd.s32 1, %s513_s11 }
   0x8   : > { %p28_p0 = scmp.ge.s32.totalorder %s27_s17, 2  ;;  %p72_p1 = scmp.ne.s32.totalorder %s513_s11, %s509_s10 }
   0x9   : > { %p73_p2 = scmp.eq.s32.totalorder %s525_s14, 0  ;;  %p78_p3 = scmp.ne.s32.totalorder %s509_s10, %s505_s9 }
   0xa   : > { %s740_s17 = smov (%p28_p0, %s27_s17), 0  ;;  %p79_p5 = scmp.eq.s32.totalorder %s331_s15, 0 }
   0xb   : > { %p586_p4 = por %p73_p2, %p72_p1  ;;  %s61_s20 = ssub.s32 %s521_s13, %s740_s17 }
   0xc   : > { %p104_p6 = scmp.eq.s32.totalorder %s331_s15, 1  ;;  %p63_p7 = scmp.eq.s32.totalorder %s61_s20, 0 }
   0xd   : > { %p592_p8 = por %p79_p5, %p78_p3  ;;  %p110_p10 = scmp.eq.s32.totalorder %s332_s16, 1 }
   0xe   : > { %p596_p9 = por %p104_p6, %p72_p1  ;;  %p361_p13 = scmp.lt.s32.totalorder %s525_s14, 2 }
   0xf   : > { %s601_s23 = scalar_select %p63_p7, %s513_s11, %s65_s18  }
  0x10   : > { %s726_s22 = scalar_select %p596_p9, 1, 0 }
  0x11   : > { %p603_p11 = por %p110_p10, %p78_p3  ;;  %s137_s25 = sand.u32 1, %s513_s11  }
  0x12   : > { %s336_s26 = sshll.u32 %s137_s25, 5  ;;  %s347_s27 = sshll.u32 %s521_s13, 9 }
  0x13   : > { %s727_s24 = scalar_select %p603_p11, 1, 0 }
  0x14   : > { %s614_s30 = scalar_lea.hbm %s721_s1, %s347_s27  ;;  %s141_s3 = scalar_lea.vmem [#allocation2], %s336_s26 }
  0x15   : > { %s151_s4 = sshll.u32 %s141_s3, 4  ;;  %p620_p0 = pnand %p361_p13, %p586_p4  ;;  %s616_s4 = int_to_ptr.vmem [resolvable:$true] %s151_s4 }
  0x16   : > { %s138_s6 = scalar_lea.sflag [#allocation3], %s137_s25  ;;  %s413_s7 = scalar_lea.hbm %s614_s30, 512 }
  0x17   : > { %p414_p3 = scmp.ne.s32.totalorder %s614_s30, %s413_s7  ;;  %p415_p5 = pneg %p620_p0 }
  0x18   : > { %s418_s16 = scalar_lea.hbm %s721_s1, 1024  ;;  %p419_p4 = scmp.lt.u32.totalorder %s614_s30, %s721_s1 }
  0x19   : > { %p416_p6 = pnand %p415_p5, %p414_p3  ;;  %p420_p10 = scmp.lt.u32.totalorder %s418_s16, %s413_s7 }
  0x1a   : > { %p422_p12 = scmp.lt.u32.totalorder %s413_s7, %s614_s30 }
  0x1b   : > { %p417_p7 = pneg %p416_p6  ;;  %p421_p13 = por %p420_p10, %p419_p4 }
  0x1d   : > { %p423_p1 = por %p422_p12, %p421_p13 }
  0x1f   : > { %p424_p2 = pnand %p423_p1, %p417_p7 }
  0x21   : > { %427 = shalt.err (!%p424_p2)
}
  0x22   : > { %s428_s20 = scalar_lea.vmem %s616_s4, 512  ;;  %s527_s25 = smov [#allocation2]  }
  0x23   : > { %p429_p3 = scmp.ne.s32.totalorder %s616_s4, %s428_s20  ;;  %s433_s26 = sshll.u32 %s527_s25, 4  ;;  %s434_s26 = int_to_ptr.vmem [resolvable:$false] %s433_s26 }
  0x24   : > { %s435_s27 = scalar_lea.vmem %s434_s26, 1024  ;;  %p436_p9 = scmp.lt.s32.totalorder %s616_s4, %s434_s26 }
  0x25   : > { %p431_p6 = pnand %p429_p3, %p415_p5  ;;  %p437_p4 = scmp.lt.s32.totalorder %s435_s27, %s428_s20 }
  0x27   : > { %p432_p11 = pneg %p431_p6  ;;  %p438_p10 = por %p437_p4, %p436_p9 }
  0x29   : > { %p439_p12 = pnand %p438_p10, %p432_p11 }
  0x2b   : > { %442 = shalt.err (!%p439_p12)
}
  0x2c   : > { %356 = dma.hbm_to_vmem [thread:$0]  (!%p620_p0), %s614_s30, 512, %s616_s4, %s138_s6  }
  0x2d   : > { %p729_p1 = scmp.lt.s32.totalorder %s525_s14, 3  ;;  %p730_p2 = scmp.ge.s32.totalorder %s525_s14, 1 }
  0x2f   : > { %p157_p5 = pnand %p730_p2, %p729_p1 }
  0x30   : > { %s656_s28 = sand.u32 (!%p157_p5), 1, %s509_s10  }
  0x31   : > { %160 = sbr.rel (%p157_p5) target bundleno = 204 (0xcc), region = 28  ;;  %s340_s29 = sshll.u32 (!%p157_p5), %s656_s28, 5 }
  0x32   : > { %s163_s3 = scalar_lea.sflag (!%p157_p5), [#allocation3], %s656_s28  ;;  %s166_s7 = scalar_lea.vmem (!%p157_p5), [#allocation2], %s340_s29 }
  0x38   : > { %496 = dma.done.wait (%p592_p8), %s163_s3, 512  }
  0x39   : > { %498 = vsyncadd (%p592_p8), %s163_s3, 4294966784  ;;  %v528_v0 = vmov 0   ;;  %v201_v1 = vld [vmem:[%s720_s0] sm:$0xff]  ;;  %v198_v3 = vld [vmem:[%s166_s7 + $0x8] sm:$0xff]  ;;  %s348_s5 = sshll.u32 %s517_s12, 9  ;;  %s190_s6 = scalar_lea.vmem [#allocation5], %s340_s29 }
  0x3a   : > { %412 = vset.pattern.permute.xlu0 %v528_v0  ;;  %v197_v2 = vld [vmem:[%s166_s7] sm:$0xff]  ;;  %v199_v4 = vld [vmem:[%s166_s7 + $0x10] sm:$0xff]  ;;  %v200_v5 = vld [vmem:[%s166_s7 + $0x18] sm:$0xff]  ;;  %s232_s8 = sshll.u32 %s190_s6, 4  ;;  %s671_s16 = scalar_lea.hbm %s722_s2, %s348_s5  ;;  %s673_s8 = int_to_ptr.vmem [resolvable:$true] %s232_s8 }
  0x3b   : > { %204 = vperm.xlu0 %412, %v201_v1   ;;  %s216_s12 = scalar_lea.sflag [#allocation4], %s656_s28  ;;  %s443_s18 = scalar_lea.vmem %s673_s8, 512 }
  0x3c   : > { %p444_p8 = scmp.ne.s32.totalorder %s673_s8, %s443_s18  ;;  %p731_p9 = scmp.ne.s32.totalorder %s726_s22, 0 }
  0x3d   : > { %s529_s19 = smov [#allocation5]  }
  0x3e   : > { %p445_p11 = pnand %p444_p8, %p731_p9  ;;  %s447_s20 = sshll.u32 %s529_s19, 4  ;;  %s448_s20 = int_to_ptr.vmem [resolvable:$false] %s447_s20 }
  0x3f   : > { %s449_s25 = scalar_lea.vmem %s448_s20, 1024  ;;  %p450_p7 = scmp.lt.s32.totalorder %s673_s8, %s448_s20 }
  0x40   : > { %p446_p0 = pneg %p445_p11  ;;  %p451_p13 = scmp.lt.s32.totalorder %s449_s25, %s443_s18 }
  0x42   : > { %p452_p3 = por %p451_p13, %p450_p7 }
  0x44   : > { %p453_p6 = pnand %p452_p3, %p446_p0 }
  0xba   : > { %v205_v6 = vpop.permute.xlu0 %204 }
  0xbb   : > { %v207_v7 = vmul.f32 %v205_v6, %v197_v2  ;;  %v208_v8 = vmul.f32 %v205_v6, %v198_v3  ;;  %v209_v9 = vmul.f32 %v205_v6, %v199_v4  ;;  %v210_v10 = vmul.f32 %v205_v6, %v200_v5 }
  0xbd   : > { %211 = vst [vmem:[%s190_s6] sm:$0xff] %v207_v7  ;;  %212 = vst [vmem:[%s190_s6 + $0x8] sm:$0xff] %v208_v8 }
  0xbe   : > { %213 = vst [vmem:[%s190_s6 + $0x10] sm:$0xff] %v209_v9  ;;  %214 = vst [vmem:[%s190_s6 + $0x18] sm:$0xff] %v210_v10 }
  0xbf   : > { %456 = shalt.err (!%p453_p6)
}
  0xc0   : > { %s457_s26 = scalar_lea.hbm %s671_s16, 512  ;;  %s461_s29 = scalar_lea.hbm %s722_s2, 1024 }
  0xc1   : > { %p458_p4 = scmp.ne.s32.totalorder %s671_s16, %s457_s26  ;;  %p462_p1 = scmp.lt.u32.totalorder %s671_s16, %s722_s2 }
  0xc2   : > { %p463_p2 = scmp.lt.u32.totalorder %s461_s29, %s457_s26  ;;  %p465_p8 = scmp.lt.u32.totalorder %s457_s26, %s671_s16 }
  0xc3   : > { %p459_p10 = pnand %p458_p4, %p731_p9 }
  0xc4   : > { %p464_p5 = por %p463_p2, %p462_p1 }
  0xc5   : > { %p460_p12 = pneg %p459_p10 }
  0xc6   : > { %p466_p11 = por %p465_p8, %p464_p5 }
  0xc8   : > { %p467_p0 = pnand %p466_p11, %p460_p12 }
  0xca   : > { %470 = shalt.err (!%p467_p0)
}
  0xcb   : > { %351 = dma.vmem_to_hbm [thread:$0]  (%p731_p9), %s673_s8, 512, %s671_s16, %s216_s12  }
  0xcc PF: > { %s244_s30 = sand.u32 1, %s505_s9   ;;  %p732_p7 = scmp.ne.s32.totalorder %s727_s24, 0 }
  0xcd   : > { %p733_p13 = scmp.ge.s32.totalorder %s525_s14, 2  ;;  %s245_s4 = scalar_lea.sflag [#allocation4], %s244_s30 }
  0xcf   : > { %p358_p3 = pnand %p733_p13, %p732_p7 }
  0xd1   : > { %500 = dma.done.wait (!%p358_p3), %s245_s4, 512  }
  0xd2   : > { %502 = vsyncadd (!%p358_p3), %s245_s4, 4294966784  ;;  %s18_s14 = sadd.s32 1, %s525_s14   ;;  %s734_s9 = smov %s509_s10 }
  0xd3   : > { %p15_p6 = scmp.ge.s32.totalorder %s18_s14, 4   ;;  %s735_s10 = smov %s513_s11 }
  0xd4   : > { %s736_s11 = smov %s601_s23  ;;  %s737_s12 = smov %s521_s13 }
  0xd5   : > { %s738_s13 = smov %s740_s17  ;;  %17 = sbr.rel (!%p15_p6) target bundleno = 6 (0x6), region = 76 }
  0xdc   :  { %250 = vsyncpa [#allocation3], 1 }
  0xdd   :  { %252 = vsyncpa [#allocation3 + $0x1], 1 }
  0xde   :  { %253 = vsyncpa [#allocation4], 1 }
  0xdf   :  { %255 = vsyncpa [#allocation4 + $0x1], 1 }

</bundles_post_ra>
